<compile_context>
chip_gen: v5e
topology: v5e:2x2
jax: 0.10.0
libtpu: 0.0.40
codegen_flags: <defaults>
</compile_context>

<pallas_src>
import functools
import math

import jax
import jax.numpy as jnp
from jax.experimental import pallas as pl
from jax.experimental.pallas import tpu as pltpu


def _pos_enc_kernel(ids_ref, emb_ref, pe_ref, o_ref, rows_ref, *, scale, seq_tile, seq_len):
    """One (seq-tile, batch) grid step.

    ids_ref : (B*S,) int32 in SMEM   (scalar-prefetched token ids)
    emb_ref : (Vp, D) f32 in VMEM    (resident: constant block index)
    pe_ref  : (Ts, D) f32 in VMEM    (re-used across the inner batch loop)
    o_ref   : (1, Ts, D)             (lane-dense output tile)
    rows_ref: (Ts, D) f32 VMEM scratch (gathered embedding rows)
    """
    s = pl.program_id(0)          # seq-tile index (outer, parallel)
    b = pl.program_id(1)          # batch index    (inner, arbitrary)
    base = b * seq_len + s * seq_tile

    # Row gather: touch only the Ts rows this tile needs (O(Ts*D) VMEM reads,
    # not O(V*D) as with a full-table take_along_axis).
    @pl.loop(0, seq_tile)
    def _(i):
        tok = ids_ref[base + i]                                # scalar read from SMEM
        rows_ref[pl.ds(i, 1), :] = emb_ref[pl.ds(tok, 1), :]   # one (1, D) row

    # Vectorized scale + PE add in f32, one lane-dense store of the whole tile.
    o_ref[0] = (rows_ref[...] * scale + pe_ref[...]).astype(o_ref.dtype)


def _pick_seq_tile(seq_len, d_model, itemsize=4, cap_tokens=512, cap_bytes=2 * 1024 * 1024):
    """Largest multiple-of-8 divisor of seq_len under the token/byte caps.

    Falls back to the full sequence length (a block equal to the array dim is always legal),
    so the (8, 128) BlockSpec constraint can never be violated.
    """
    cap = min(cap_tokens, max(8, (cap_bytes // (d_model * itemsize)) // 8 * 8))
    best = None
    for t in range(8, min(seq_len, cap) + 1, 8):
        if seq_len % t == 0:
            best = t
    return best if best is not None else seq_len


def _vmem_limit_bytes(vocab_p, d_model, seq_tile, out_itemsize):
    """VMEM budget from the actual footprint, clamped to this generation's capacity."""
    table = vocab_p * d_model * 4 * 2            # resident table (pipeline allocates 2 buffers)
    pe = seq_tile * d_model * 4 * 2              # double-buffered PE tile
    out = seq_tile * d_model * out_itemsize * 2  # double-buffered output tile
    rows = seq_tile * d_model * 4                # gather scratch
    need = table + pe + out + rows + (4 << 20)   # headroom for Mosaic internals
    try:
        cap = pltpu.get_tpu_info().vmem_capacity_bytes
    except Exception:
        cap = 64 << 20                           # conservative (v7x per-core)
    ceiling = cap - cap // 8                     # ~112 MiB on v5e/v6e, ~56 MiB on v7x
    return max(min(need, ceiling), 32 << 20)


def positional_encoding_forward(x, emb_weight, pe, *, out_dtype=jnp.float32):
    """x: (B, S) int32 token ids -> (B, S, d_model) out_dtype."""
    B, S = x.shape
    vocab_size, d_model = emb_weight.shape
    max_len = pe.shape[0]
    assert S <= max_len, "sequence longer than the positional-encoding table"
    assert d_model % 128 == 0, "d_model must be a multiple of the 128-lane vreg width"

    Ts = _pick_seq_tile(S, d_model)
    scale = math.sqrt(float(d_model))

    # Pad the vocab (sublane) dim to a multiple of 8 so the resident table tiles cleanly.
    pad = (-vocab_size) % 8
    emb_p = jnp.pad(emb_weight, ((0, pad), (0, 0))) if pad else emb_weight
    vocab_p = vocab_size + pad

    # Token ids: flattened 1-D int32 so the scalar-prefetch SMEM footprint stays minimal.
    ids = x.astype(jnp.int32).reshape(-1)
    # PE rows stay f32 (arithmetic in f32; the store casts to out_dtype for free).
    pe_s = pe[:S].astype(jnp.float32)

    # TODO(synk): for vocabularies where vocab_p*d_model*4*2 exceeds ~the v7x 56 MiB budget,
    # switch to an HBM-resident table (memory_space=pl.ANY) with a double-buffered per-row
    # DMA gather (or a bf16 table) instead of VMEM residency.
    kernel = functools.partial(_pos_enc_kernel, scale=scale, seq_tile=Ts, seq_len=S)

    grid_spec = pltpu.PrefetchScalarGridSpec(
        num_scalar_prefetch=1,           # ids -> SMEM; passed to kernel + index_maps
        grid=(S // Ts, B),               # seq-tile outermost, batch innermost: the PE block
                                         # index (s, 0) is invariant over the inner loop, so
                                         # Pallas does not re-DMA PE rows per batch element.
        in_specs=[
            # embedding table: constant block index -> stays resident in VMEM
            pl.BlockSpec((vocab_p, d_model), lambda s, b, ids: (0, 0)),
            # positional rows for this seq tile
            pl.BlockSpec((Ts, d_model), lambda s, b, ids: (s, 0)),
        ],
        out_specs=pl.BlockSpec((1, Ts, d_model), lambda s, b, ids: (b, s, 0)),
        scratch_shapes=[pltpu.VMEM((Ts, d_model), jnp.float32)],
    )

    return pl.pallas_call(
        kernel,
        out_shape=jax.ShapeDtypeStruct((B, S, d_model), out_dtype),
        grid_spec=grid_spec,
        compiler_params=pltpu.CompilerParams(
            # Outer seq-tile axis is independent -> shard across v7x's two TensorCores.
            # Inner batch axis revisits the same PE block -> "arbitrary".
            dimension_semantics=("parallel", "arbitrary"),
            vmem_limit_bytes=_vmem_limit_bytes(vocab_p, d_model, Ts,
                                               jnp.dtype(out_dtype).itemsize),
        ),
    )(ids, emb_p, pe_s)


def make_sinusoidal_pe(max_len, d_model):
    position = jnp.arange(max_len, dtype=jnp.float32)[:, None]
    div_term = jnp.exp(
        jnp.arange(0, d_model, 2, dtype=jnp.float32) * (-math.log(10000.0) / d_model))
    pe = jnp.zeros((max_len, d_model), dtype=jnp.float32)
    pe = pe.at[:, 0::2].set(jnp.sin(position * div_term))
    pe = pe.at[:, 1::2].set(jnp.cos(position * div_term))
    return pe


if __name__ == "__main__":
    # Small deterministic config.  d_model=128 keeps the output tile lane-dense.
    vocab_size, d_model, max_len = 50, 128, 512
    B, S = 2, 8

    key = jax.random.PRNGKey(0)
    k_emb, k_ids = jax.random.split(key)

    emb_weight = jax.random.normal(k_emb, (vocab_size, d_model), dtype=jnp.float32)
    pe = make_sinusoidal_pe(max_len, d_model)
    x = jax.random.randint(k_ids, (B, S), minval=0, maxval=vocab_size, dtype=jnp.int32)

    out = positional_encoding_forward(x, emb_weight, pe)
    out = jax.block_until_ready(out)

    # Pure-JAX reference check.
    ref = emb_weight[x] * math.sqrt(d_model) + pe[None, :S, :]
    assert out.shape == (B, S, d_model)
    assert jnp.allclose(out, ref, atol=1e-5, rtol=1e-5)

    print("KERNEL_OK")
</pallas_src>

<mosaic_0001>
module attributes {stable_mosaic.version = 11 : i64} {
  func.func @_pos_enc_kernel(%arg0: i32, %arg1: i32, %arg2: memref<16xi32, #tpu.memory_space<smem>>, %arg3: memref<56x128xf32, #tpu.memory_space<vmem>>, %arg4: memref<8x128xf32, #tpu.memory_space<vmem>>, %arg5: memref<1x8x128xf32, #tpu.memory_space<vmem>>, %arg6: memref<8x128xf32, #tpu.memory_space<vmem>>) attributes {dimension_semantics = [#tpu.dimension_semantics<parallel>, #tpu.dimension_semantics<arbitrary>], iteration_bounds = array<i64: 1, 2>, scalar_prefetch = 1 : i64, scratch_operands = 1 : i64, tpu.core_type = #tpu.core_type<tc>, window_params = [{pipeline_mode = #tpu.pipeline_mode<synchronous>, transform_indices = @transform_0, window_bounds = array<i64: 56, 128>}, {transform_indices = @transform_1, window_bounds = array<i64: 8, 128>}, {transform_indices = @transform_2, window_bounds = array<i64: 1, 8, 128>}]} {
    %c8_i32 = arith.constant 8 : i32
    %0 = arith.muli %arg1, %c8_i32 : i32
    %c8_i32_0 = arith.constant 8 : i32
    %1 = arith.muli %arg0, %c8_i32_0 : i32
    %2 = arith.addi %0, %1 : i32
    %c0_i32 = arith.constant 0 : i32
    %c8_i32_1 = arith.constant 8 : i32
    %3 = arith.addi %c0_i32, %c8_i32_1 : i32
    %c1_i32 = arith.constant 1 : i32
    scf.for %arg7 = %c0_i32 to %3 step %c1_i32  : i32 {
      %c1_i32_9 = arith.constant 1 : i32
      %12 = arith.muli %arg7, %c1_i32_9 : i32
      %c0_i32_10 = arith.constant 0 : i32
      %13 = arith.addi %c0_i32_10, %12 : i32
      %14 = arith.addi %2, %13 : i32
      %15 = arith.index_cast %14 : i32 to index
      %16 = memref.load %arg2[%15] : memref<16xi32, #tpu.memory_space<smem>>
      %17 = arith.index_cast %16 : i32 to index
      %c0_11 = arith.constant 0 : index
      %18 = vector.load %arg3[%17, %c0_11] : memref<56x128xf32, #tpu.memory_space<vmem>>, vector<1x128xf32>
      %19 = arith.index_cast %13 : i32 to index
      %c0_12 = arith.constant 0 : index
      %20 = vector.load %arg6[%19, %c0_12] : memref<8x128xf32, #tpu.memory_space<vmem>>, vector<1x128xf32>
      tpu.vector_store %arg6[%19, %c0_12], %18 {strides = array<i32>} : memref<8x128xf32, #tpu.memory_space<vmem>>, vector<1x128xf32>,
    }
    %c8_i32_2 = arith.constant 8 : i32
    %c0 = arith.constant 0 : index
    %c0_3 = arith.constant 0 : index
    %4 = vector.load %arg6[%c0, %c0_3] : memref<8x128xf32, #tpu.memory_space<vmem>>, vector<8x128xf32>
    %cst = arith.constant 11.3137083 : f32
    %5 = vector.broadcast %cst : f32 to vector<8x128xf32>
    %6 = arith.mulf %4, %5 : vector<8x128xf32>
    %c0_4 = arith.constant 0 : index
    %c0_5 = arith.constant 0 : index
    %7 = vector.load %arg4[%c0_4, %c0_5] : memref<8x128xf32, #tpu.memory_space<vmem>>, vector<8x128xf32>
    %8 = arith.addf %6, %7 : vector<8x128xf32>
    %c0_6 = arith.constant 0 : index
    %c0_7 = arith.constant 0 : index
    %c0_8 = arith.constant 0 : index
    %9 = vector.load %arg5[%c0_6, %c0_7, %c0_8] : memref<1x8x128xf32, #tpu.memory_space<vmem>>, vector<1x8x128xf32>
    %10 = vector.shape_cast %9 : vector<1x8x128xf32> to vector<8x128xf32>
    %11 = vector.shape_cast %8 : vector<8x128xf32> to vector<1x8x128xf32>
    tpu.vector_store %arg5[%c0_6, %c0_7, %c0_8], %11 {strides = array<i32>} : memref<1x8x128xf32, #tpu.memory_space<vmem>>, vector<1x8x128xf32>,
    return
  }
  func.func @transform_0(%arg0: i32, %arg1: i32, %arg2: memref<16xi32, #tpu.memory_space<smem>>) -> (i32, i32) {
    %c0_i32 = arith.constant 0 : i32
    %c0_i32_0 = arith.constant 0 : i32
    %c0_i32_1 = arith.constant 0 : i32
    return %c0_i32, %c0_i32_0 : i32, i32
  }
  func.func @transform_1(%arg0: i32, %arg1: i32, %arg2: memref<16xi32, #tpu.memory_space<smem>>) -> (i32, i32) {
    %c0_i32 = arith.constant 0 : i32
    %c0_i32_0 = arith.constant 0 : i32
    return %arg0, %c0_i32 : i32, i32
  }
  func.func @transform_2(%arg0: i32, %arg1: i32, %arg2: memref<16xi32, #tpu.memory_space<smem>>) -> (i32, i32, i32) {
    %c0_i32 = arith.constant 0 : i32
    %c0_i32_0 = arith.constant 0 : i32
    return %arg1, %arg0, %c0_i32 : i32, i32, i32
  }
}

</mosaic_0001>

<bundles_post_ra>
// kernel: tpu_custom_call.1
= control target key start
LH: loop header
LB: loop body
LE: loop exit
PB: predicated region body
PF: predicated region fallthrough
CT: control target
= control target key end

     0   :  { %s579_s15 = smov [#allocation4]   ;;  %s727_s0 = inlined_call_operand.hbm [shape: s32[16], index: 0, kind: input, shape index: {}]   ;;  %s728_s1 = inlined_call_operand.hbm [shape: f32[56,128], index: 1, kind: input, shape index: {}]   ;;  %s729_s2 = inlined_call_operand.hbm [shape: f32[8,128], index: 2, kind: input, shape index: {}]   ;;  %s730_s3 = inlined_call_operand.hbm [shape: f32[2,8,128], index: 3, kind: output, shape index: {}]  }
   0x1   :  { %s9_s14 = sshll.u32 %s727_s0, 4  ;;  %s10_s14 = int_to_ptr.hbm [resolvable:$true] %s9_s14 }
   0x2   :  { %12 = dma.hbm_to_smem %s10_s14, 16, %s579_s15, [#allocation3] }
   0x3   :  { %537 = dma.done.wait [#allocation3], 16 }
   0x4   :  { %538 = vsyncadd [#allocation3], 4294967280 }
   0x5   :  { %15 = sfence }
   0x6   :  { %16 = vsyncpa [#allocation6], 0 }
   0x7   :  { %17 = vsyncpa [#allocation9], 0 }
   0x8   :  { %18 = vsyncpa [#allocation7], 0 }
   0x9   :  { %20 = vsyncpa [#allocation7 + $0x1], 0  ;;  %s607_s16 = smov 0   ;;  %s609_s17 = smov 0  }
   0xa   :  { %s611_s18 = smov 0   ;;  %s613_s19 = smov 0  }
   0xb   :  { %s615_s20 = smov 0   ;;  %s617_s0 = smov 0  }
   0xc LB: > { %s308_s21 = sadd.s32 4294967295, %s573_s0   ;;  %s309_s22 = sadd.s32 4294967294, %s573_s0   ;;  %s573_s0 = sphi %s617_s0, %s26_s0   ;;  %s569_s20 = sphi %s615_s20, %s739_s20   ;;  %s565_s19 = sphi %s613_s19, %s738_s19   ;;  %s561_s18 = sphi %s611_s18, %s737_s18   ;;  %s557_s17 = sphi %s609_s17, %s736_s17   ;;  %s553_s16 = sphi %s607_s16, %s735_s16  }
   0xd   : > { %s35_s23 = sadd.s32 1, %s569_s20  ;;  %s94_s24 = sadd.s32 1, %s561_s18 }
   0xe   : > { %p36_p0 = scmp.ge.s32.totalorder %s35_s23, 2  ;;  %p104_p1 = scmp.ne.s32.totalorder %s561_s18, %s557_s17 }
   0xf   : > { %p105_p2 = scmp.eq.s32.totalorder %s308_s21, 1  ;;  %p110_p3 = scmp.ne.s32.totalorder %s557_s17, %s553_s16 }
  0x10   : > { %s741_s23 = smov (%p36_p0, %s35_s23), 0  ;;  %p111_p5 = scmp.eq.s32.totalorder %s309_s22, 1 }
  0x11   : > { %p647_p4 = por %p105_p2, %p104_p1  ;;  %s89_s26 = ssub.s32 %s569_s20, %s741_s23 }
  0x12   : > { %p310_p6 = scmp.ge.s32.totalorder %s573_s0, 1  ;;  %p92_p7 = scmp.eq.s32.totalorder %s89_s26, 0 }
  0x13   : > { %p654_p8 = por %p111_p5, %p110_p3  ;;  %p118_p9 = scmp.lt.s32.totalorder %s573_s0, 3 }
  0x14   : > { %s660_s28 = scalar_select %p92_p7, %s561_s18, %s94_s24  }
  0x15   : > { %p662_p10 = pnand %p310_p6, %p118_p9  ;;  %p666_p11 = scmp.eq.s32.totalorder %s308_s21, 0 }
  0x16   : > { %s129_s6 = sshll.u32 %s728_s1, 4  ;;  %s580_s7 = smov [#allocation5]   ;;  %s130_s6 = int_to_ptr.hbm [resolvable:$true] %s129_s6 }
  0x17   : > { %p332_p12 = pneg %p662_p10  ;;  %s131_s8 = sshll.u32 %s580_s7, 4  ;;  %s132_s8 = int_to_ptr.vmem [resolvable:$true] %s131_s8 }
  0x18   : > { %s146_s11 = sshll.u32 %s729_s2, 4  ;;  %s581_s12 = smov 128   ;;  %s147_s11 = int_to_ptr.hbm [resolvable:$true] %s146_s11 }
  0x19   : > { %p333_p13 = pnand %p666_p11, %p332_p12  ;;  %s582_s13 = smov 8  }
  0x1a   : > { %s583_s14 = smov [#allocation8]   ;;  %161 = sbr.rel (%p662_p10) target bundleno = 61 (0x3d), region = 28 }
  0x1b   : > { %335 = dma.hbm_to_vmem [thread:$0]  (!%p333_p13), %s130_s6, 896, %s132_s8, [#allocation6], %s581_s12, %s581_s12, %s582_s13  }
  0x1c   : > { %s148_s15 = sshll.u32 %s583_s14, 4  ;;  %s149_s15 = int_to_ptr.vmem [resolvable:$true] %s148_s15 }
  0x1d   : > { %338 = dma.hbm_to_vmem [thread:$0]  (!%p333_p13), %s147_s11, 128, %s149_s15, [#allocation9]  }
  0x1f   : > { %540 = dma.done.wait (%p666_p11), [#allocation6], 896  }
  0x20   : > { %542 = vsyncadd (%p666_p11), [#allocation6], 4294966400 }
  0x21   : > { %544 = dma.done.wait (%p666_p11), [#allocation9], 128  }
  0x22   : > { %546 = vsyncadd (%p666_p11), [#allocation9], 4294967168  ;;  %s181_s21 = sand.u32 1, %s557_s17   ;;  %s317_s22 = sshll.u32 %s565_s19, 3 }
  0x23   : > { %s316_s24 = sshll.u32 %s181_s21, 3  ;;  %s575_s29 = smov 0  }
  0x24   : > { %s183_s26 = scalar_lea.vmem [#allocation10], %s316_s24 }
  0x25 LB: >> { %s193_s4 = sadd.s32 %s577_s29, %s317_s22  ;;  %s197_s7 = scalar_lea.vmem [#allocation2], %s577_s29  ;;  %s577_s29 = sphi %s575_s29, %s192_s29  }
  0x26   : >> { %s194_s5 = sld [smem:[#allocation4 + %s193_s4]]  ;;  %s192_s29 = sadd.s32 1, %s577_s29  }
  0x27   : >> { %p189_p0 = scmp.ge.s32.totalorder %s192_s29, 8  }
  0x28   : > { %v201_v2 = vld [vmem:[#allocation8] sm:$0xff] (%p189_p0)  ;;  %s216_s8 = scalar_lea.hbm (%p189_p0), %s730_s3, %s317_s22  ;;  %s218_s9 = sshll.u32 (%p189_p0), %s183_s26, 4  ;;  %s219_s9 = int_to_ptr.vmem [resolvable:$true] %s218_s9 }
  0x29   : > { %s220_s10 = sshll.u32 (%p189_p0), %s216_s8, 4  ;;  %s205_s11 = scalar_lea.sflag (%p189_p0), [#allocation7], %s181_s21  ;;  %s221_s10 = int_to_ptr.hbm [resolvable:$true] %s220_s10 }
  0x2a   : > { %191 = sbr.rel (!%p189_p0) target bundleno = 37 (0x25), region = 79  ;;  %s495_s12 = sshra.s32 (%p189_p0), %s221_s10, 4  ;;  %s496_s12 = int_to_ptr.hbm [resolvable:$true] %s495_s12 }
  0x2b   : > { %s497_s13 = scalar_lea.hbm (%p189_p0), %s496_s12, 8  ;;  %s501_s24 = scalar_lea.hbm (%p189_p0), %s730_s3, 16 }
  0x2c   : >> { %s195_s6 = scalar_lea.vmem [#allocation5], %s194_s5  ;;  %p498_p1 = scmp.ne.s32.totalorder (%p189_p0), %s496_s12, %s497_s13 }
  0x2d   : >> { %v196_v0 = vld [vmem:[%s195_s6] sm:$0x1]  ;;  %p502_p5 = scmp.lt.s32.totalorder (%p189_p0), %s496_s12, %s730_s3  ;;  %p503_p6 = scmp.lt.s32.totalorder (%p189_p0), %s501_s24, %s497_s13 }
  0x2e   : >> { %198 = vst [vmem:[%s197_s7] sm:$0x1] %v196_v0  ;;  %p499_p2 = pnand (%p189_p0), %p498_p1, %p647_p4 }
  0x2f   : > { %p504_p7 = por %p503_p6, %p502_p5 }
  0x30   : > { %p500_p3 = pneg %p499_p2 }
  0x32   : > { %p505_p9 = pnand %p504_p7, %p500_p3 }
  0x35   : > { %v199_v1 = vld [vmem:[#allocation2] sm:$0xff] }
  0x36   : > { %v200_v3 = vmul.f32 11.313708, %v199_v1 }
  0x38   : > { %v202_v4 = vadd.f32 %v201_v2, %v200_v3 }
  0x3a   : > { %203 = vst [vmem:[%s183_s26] sm:$0xff] %v202_v4 }
  0x3b   : > { %508 = shalt.err (!%p505_p9)
}
  0x3c   : > { %330 = dma.vmem_to_hbm [thread:$0]  (%p647_p4), %s219_s9, 128, %s221_s10, %s205_s11  }
  0x3d PF: > { %p347_p10 = scmp.ge.s32.totalorder %s573_s0, 2  ;;  %s232_s21 = sand.u32 1, %s553_s16  }
  0x3e   : > { %s233_s26 = scalar_lea.sflag [#allocation7], %s232_s21 }
  0x3f   : > { %p340_p11 = pnand %p347_p10, %p654_p8 }
  0x41   : > { %p341_p12 = pneg %p340_p11 }
  0x43   : > { %548 = dma.done.wait (%p341_p12), %s233_s26, 128  }
  0x44   : > { %550 = vsyncadd (%p341_p12), %s233_s26, 4294967168  ;;  %s26_s0 = sadd.s32 1, %s573_s0   ;;  %s735_s16 = smov %s557_s17 }
  0x45   : > { %p23_p13 = scmp.ge.s32.totalorder %s26_s0, 4   ;;  %s736_s17 = smov %s561_s18 }
  0x46   : > { %s737_s18 = smov %s660_s28  ;;  %s738_s19 = smov %s569_s20 }
  0x47   : > { %s739_s20 = smov %s741_s23  ;;  %25 = sbr.rel (!%p23_p13) target bundleno = 12 (0xc), region = 90 }
  0x4c   :  { %239 = vsyncpa [#allocation6], 1 }
  0x4d   :  { %241 = vsyncpa [#allocation6 + $0x1], 1 }
  0x4e   :  { %242 = vsyncpa [#allocation9], 1 }
  0x4f   :  { %243 = vsyncpa [#allocation7], 1 }
  0x50   :  { %245 = vsyncpa [#allocation7 + $0x1], 1 }

</bundles_post_ra>
